<compile_context>
chip_gen: v5e
topology: v5e:2x2
jax: 0.10.0
libtpu: 0.0.40
codegen_flags: <defaults>
</compile_context>

<pallas_src>
import functools

import jax
import jax.numpy as jnp
from jax.experimental import pallas as pl
from jax.experimental.pallas import tpu as pltpu


def _deep_cindex_kernel(x_ref, w1_ref, b1_ref, w2_ref, b2_ref,
                        tcol_ref, trow_ref,
                        est_out_ref, cindex_ref,
                        est_col_sc, num_sc, den_sc,
                        *, half_inv_sigma):
    i = pl.program_id(0)
    j = pl.program_id(1)
    last_i = pl.num_programs(0) - 1
    last_j = pl.num_programs(1) - 1

    @pl.when((i == 0) & (j == 0))
    def _init():
        num_sc[...] = jnp.zeros_like(num_sc)
        den_sc[...] = jnp.zeros_like(den_sc)

    # ---- Stage 1a: row-layout (unscaled) estimates for batch tile j.
    # Runs only on the i == 0 row (x block index is j there); written once per
    # tile into the resident (NT, TB) output block -> single HBM flush at end.
    @pl.when(i == 0)
    def _mlp_row():
        h = jnp.dot(x_ref[...], w1_ref[...],
                    preferred_element_type=jnp.float32)          # (TB, H)
        h = jnp.maximum(h + b1_ref[...], 0.0)
        est_row = (jax.lax.dot_general(                           # (1, TB)
            w2_ref[...], h, (((1,), (1,)), ((), ())),
            preferred_element_type=jnp.float32) + b2_ref[...])
        est_out_ref[pl.ds(j, 1), :] = est_row

    # ---- Stage 1b: column-layout (pre-scaled) estimates for batch tile i.
    # Recomputed once per i-row (x block index is i when j == 0); fixed
    # (TB, 1) scratch footprint independent of B, no lane<->sublane relayout.
    @pl.when(j == 0)
    def _mlp_col():
        h = jnp.dot(x_ref[...], w1_ref[...],
                    preferred_element_type=jnp.float32)          # (TB, H)
        h = jnp.maximum(h + b1_ref[...], 0.0)
        est_col = (jnp.sum(h * w2_ref[...], axis=-1, keepdims=True)
                   + b2_ref[...])                                 # (TB, 1)
        est_col_sc[...] = est_col * half_inv_sigma

    # ---- Stage 2: pairwise soft-Harrell contribution of tile (i, j).
    # The batch is time-sorted in the wrapper, so tiles with j < i contain no
    # comparable pair and are skipped entirely.
    @pl.when(j >= i)
    def _pairwise():
        est_i = est_col_sc[...]                                   # (TB, 1), scaled
        est_j = est_out_ref[pl.ds(j, 1), :] * half_inv_sigma      # (1, TB)
        t_i = tcol_ref[...]                                       # (TB, 1), +inf if censored/pad
        t_j = trow_ref[...]                                       # (1, TB), -inf if pad

        cmp = t_i < t_j                                           # comparable-pair mask
        # sigmoid(z) == 0.5 * tanh(z/2) + 0.5 ; the z/2 scale is pre-folded.
        soft = 0.5 * jnp.tanh(est_i - est_j) + 0.5
        # Sublane-only partial sums into lane-wide accumulators.
        num_sc[...] += jnp.sum(jnp.where(cmp, soft, 0.0), axis=0, keepdims=True)
        den_sc[...] += jnp.sum(cmp.astype(jnp.float32), axis=0, keepdims=True)

    @pl.when((i == last_i) & (j == last_j))
    def _finalize():
        num = jnp.sum(num_sc[...], keepdims=True)                 # (1, 1)
        den = jnp.sum(den_sc[...], keepdims=True)                 # (1, 1)
        # Exact divide (runs once); den == 0 (no comparable pairs) -> 0.
        cindex_ref[...] = jnp.where(den > 0.0, num / jnp.maximum(den, 1.0), 0.0)


def _padded_tile_bytes(rows, cols, itemsize):
    return ((rows + 7) // 8) * 8 * ((cols + 127) // 128) * 128 * itemsize


def deep_cindex_forward(params, x, event_time, event_indicator, sigma=0.01):
    B, D = x.shape
    H = params["w1"].shape[1]

    # Pairwise tile size: always a multiple of 128, capped at 512.
    if B >= 2048:
        TB = 512
    elif B >= 256:
        TB = 256
    else:
        TB = 128
    B_pad = ((B + TB - 1) // TB) * TB
    NT = B_pad // TB
    pad = B_pad - B

    t = event_time.astype(jnp.float32).reshape(-1)
    ev = event_indicator.astype(jnp.float32).reshape(-1)
    xf = x.astype(jnp.float32)
    if pad:
        # Padded rows: event=0 and time=-inf -> zero contribution to the mask
        # on both the i side (ev=0 -> +inf column time) and the j side (-inf).
        t = jnp.concatenate([t, jnp.full((pad,), -jnp.inf, jnp.float32)])
        ev = jnp.concatenate([ev, jnp.zeros((pad,), jnp.float32)])
        xf = jnp.concatenate([xf, jnp.zeros((pad, D), jnp.float32)], axis=0)

    # Time-sort so every (i, j) tile with j < i is fully incomparable and the
    # kernel can skip its O(TB^2) work. Estimate is un-permuted afterwards.
    order = jnp.argsort(t)
    inv_order = jnp.argsort(order)
    t_s = t[order]
    ev_s = ev[order]
    x_s = xf[order]

    t_row = t_s.reshape(1, B_pad)                                    # -inf on padded rows
    t_col = jnp.where(ev_s > 0.0, t_s, jnp.inf).reshape(B_pad, 1)    # +inf if censored/pad

    # bf16 inputs for the first matmul (f32 MXU accumulation in-kernel).
    x_bf16 = x_s.astype(jnp.bfloat16)
    w1_bf16 = params["w1"].astype(jnp.bfloat16)
    b1 = params["b1"].reshape(1, H).astype(jnp.float32)
    w2 = params["w2"].reshape(1, H).astype(jnp.float32)              # (H,1) -> (1,H)
    b2 = params["b2"].reshape(1, 1).astype(jnp.float32)

    half_inv_sigma = float(0.5 / sigma)

    # Explicit VMEM budget from the actual buffer sizes (+ pairwise temps).
    vmem_bytes = (
        2 * _padded_tile_bytes(TB, D, 2)          # x blocks (double-buffered)
        + 2 * _padded_tile_bytes(D, H, 2)         # w1
        + 4 * _padded_tile_bytes(1, H, 4)         # b1, w2
        + 2 * _padded_tile_bytes(1, 1, 4)         # b2
        + 2 * _padded_tile_bytes(TB, 1, 4)        # t_col blocks
        + 2 * _padded_tile_bytes(1, TB, 4)        # t_row blocks
        + _padded_tile_bytes(NT, TB, 4)           # resident estimate output
        + _padded_tile_bytes(1, 1, 4)             # cindex output
        + _padded_tile_bytes(TB, 1, 4)            # est_col scratch
        + 2 * _padded_tile_bytes(1, TB, 4)        # num / den accumulators
        + 2 * _padded_tile_bytes(TB, H, 4)        # MLP intermediates
        + 8 * TB * TB * 4                         # pairwise (TB,TB) temporaries
    )
    vmem_limit = min(int(vmem_bytes * 1.5) + (1 << 20), 64 * 1024 * 1024)

    cost = pl.CostEstimate(
        flops=int(4 * B_pad * D * H + 4 * B_pad * H + 3 * B_pad * B_pad),
        transcendentals=int(B_pad * B_pad // 2),
        bytes_accessed=int(2 * B_pad * D * 2 + D * H * 2 + 4 * B_pad * 4),
    )

    const2d = lambda i, j: (0, 0)

    estimate_sorted, cindex = pl.pallas_call(
        functools.partial(_deep_cindex_kernel, half_inv_sigma=half_inv_sigma),
        grid=(NT, NT),
        in_specs=[
            # x tile j while i == 0 (row MLP); tile i afterwards (column MLP
            # recompute at j == 0) -> one DMA per i-row, ~2*NT DMAs total.
            pl.BlockSpec((TB, D), lambda i, j: (jnp.where(i == 0, j, i), 0)),
            pl.BlockSpec((D, H), const2d),
            pl.BlockSpec((1, H), const2d),
            pl.BlockSpec((1, H), const2d),
            pl.BlockSpec((1, 1), const2d),
            pl.BlockSpec((TB, 1), lambda i, j: (i, 0)),   # column time (event-masked)
            pl.BlockSpec((1, TB), lambda i, j: (0, j)),   # row time
        ],
        out_specs=[
            # Full-extent resident estimate block: written once per tile at
            # i == 0, read as est_j every step, flushed to HBM exactly once.
            pl.BlockSpec((NT, TB), const2d),
            pl.BlockSpec((1, 1), const2d),                # scalar cindex
        ],
        out_shape=[
            jax.ShapeDtypeStruct((NT, TB), jnp.float32),
            jax.ShapeDtypeStruct((1, 1), jnp.float32),
        ],
        scratch_shapes=[
            pltpu.VMEM((TB, 1), jnp.float32),   # pre-scaled column estimates (tile i)
            pltpu.VMEM((1, TB), jnp.float32),   # num accumulator (lane-wide)
            pltpu.VMEM((1, TB), jnp.float32),   # den accumulator (lane-wide)
        ],
        compiler_params=pltpu.CompilerParams(
            # single accumulator / resident output spans the whole grid ->
            # both axes are sequential reductions.
            dimension_semantics=("arbitrary", "arbitrary"),
            vmem_limit_bytes=vmem_limit),
        cost_estimate=cost,
    )(x_bf16, w1_bf16, b1, w2, b2, t_col, t_row)

    # Un-permute, un-pad; matches estimate.view(-1).
    estimate = estimate_sorted.reshape(-1)[inv_order][:B]
    cindex = cindex[0, 0]
    return (-1.0 * cindex, estimate, cindex, cindex)


if __name__ == "__main__":
    B, D, H = 8, 32, 32

    key = jax.random.PRNGKey(0)
    kx, kw1, kb1, kw2, kb2, kt = jax.random.split(key, 6)

    x = jax.random.normal(kx, (B, D), dtype=jnp.float32)
    params = {
        "w1": jax.random.normal(kw1, (D, H), dtype=jnp.float32) * 0.1,
        "b1": jax.random.normal(kb1, (1, H), dtype=jnp.float32) * 0.01,
        "w2": jax.random.normal(kw2, (H, 1), dtype=jnp.float32) * 0.1,
        "b2": jax.random.normal(kb2, (1, 1), dtype=jnp.float32) * 0.01,
    }

    event_time = jax.random.uniform(kt, (B,), dtype=jnp.float32,
                                    minval=0.1, maxval=10.0)
    # deterministic censoring pattern with at least some events
    event_indicator = jnp.array([1, 0, 1, 1, 0, 1, 0, 1], dtype=jnp.float32)

    sigma = 0.01
    neg_c, estimate, c1, c2 = deep_cindex_forward(
        params, x, event_time, event_indicator, sigma=sigma)
    jax.block_until_ready((neg_c, estimate, c1, c2))

    # Pure-JAX reference (same bf16 first-layer precision as the kernel).
    h_ref = jnp.maximum(
        jnp.dot(x.astype(jnp.bfloat16), params["w1"].astype(jnp.bfloat16),
                preferred_element_type=jnp.float32) + params["b1"], 0.0)
    est_ref = (h_ref @ params["w2"].astype(jnp.float32)
               + params["b2"]).reshape(-1)
    mask_ref = ((event_indicator[:, None] > 0)
                & (event_time[:, None] < event_time[None, :])).astype(jnp.float32)
    soft_ref = jax.nn.sigmoid((est_ref[:, None] - est_ref[None, :]) / sigma)
    den_ref = jnp.sum(mask_ref)
    c_ref = jnp.where(den_ref > 0,
                      jnp.sum(mask_ref * soft_ref) / jnp.maximum(den_ref, 1.0),
                      0.0)

    est_ok = bool(jnp.allclose(estimate, est_ref, atol=5e-3, rtol=5e-3))
    c_ok = bool(jnp.allclose(c1, c_ref, atol=5e-3, rtol=5e-3))
    if not (est_ok and c_ok):
        raise SystemExit(
            f"MISMATCH: est_ok={est_ok} c_ok={c_ok} "
            f"kernel_c={float(c1)} ref_c={float(c_ref)}")
    print("KERNEL_OK")
</pallas_src>

<mosaic_0001>
module attributes {stable_mosaic.version = 11 : i64} {
  func.func @_deep_cindex_kernel(%arg0: i32, %arg1: i32, %arg2: memref<128x32xbf16, #tpu.memory_space<vmem>>, %arg3: memref<32x32xbf16, #tpu.memory_space<vmem>>, %arg4: memref<1x32xf32, #tpu.memory_space<vmem>>, %arg5: memref<1x32xf32, #tpu.memory_space<vmem>>, %arg6: memref<1x1xf32, #tpu.memory_space<vmem>>, %arg7: memref<128x1xf32, #tpu.memory_space<vmem>>, %arg8: memref<1x128xf32, #tpu.memory_space<vmem>>, %arg9: memref<1x128xf32, #tpu.memory_space<vmem>>, %arg10: memref<1x1xf32, #tpu.memory_space<vmem>>, %arg11: memref<128x1xf32, #tpu.memory_space<vmem>>, %arg12: memref<1x128xf32, #tpu.memory_space<vmem>>, %arg13: memref<1x128xf32, #tpu.memory_space<vmem>>) attributes {dimension_semantics = [#tpu.dimension_semantics<arbitrary>, #tpu.dimension_semantics<arbitrary>], iteration_bounds = array<i64: 1, 1>, scalar_prefetch = 0 : i64, scratch_operands = 3 : i64, tpu.core_type = #tpu.core_type<tc>, window_params = [{transform_indices = @transform_0, window_bounds = array<i64: 128, 32>}, {pipeline_mode = #tpu.pipeline_mode<synchronous>, transform_indices = @transform_1, window_bounds = array<i64: 32, 32>}, {pipeline_mode = #tpu.pipeline_mode<synchronous>, transform_indices = @transform_2, window_bounds = array<i64: 1, 32>}, {pipeline_mode = #tpu.pipeline_mode<synchronous>, transform_indices = @transform_3, window_bounds = array<i64: 1, 32>}, {pipeline_mode = #tpu.pipeline_mode<synchronous>, transform_indices = @transform_4, window_bounds = array<i64: 1, 1>}, {transform_indices = @transform_5, window_bounds = array<i64: 128, 1>}, {transform_indices = @transform_6, window_bounds = array<i64: 1, 128>}, {pipeline_mode = #tpu.pipeline_mode<synchronous>, transform_indices = @transform_7, window_bounds = array<i64: 1, 128>}, {pipeline_mode = #tpu.pipeline_mode<synchronous>, transform_indices = @transform_8, window_bounds = array<i64: 1, 1>}]} {
    %c0_i32 = arith.constant 0 : i32
    %0 = arith.cmpi eq, %arg0, %c0_i32 : i32
    %c0_i32_0 = arith.constant 0 : i32
    %1 = arith.cmpi eq, %arg1, %c0_i32_0 : i32
    %2 = arith.andi %0, %1 : i1
    %3 = arith.extui %2 : i1 to i32
    %c0_i32_1 = arith.constant 0 : i32
    %4 = arith.cmpi ne, %3, %c0_i32_1 : i32
    scf.if %4 {
      %cst = arith.constant 0.000000e+00 : f32
      %19 = vector.broadcast %cst : f32 to vector<1x128xf32>
      %c0 = arith.constant 0 : index
      %c0_10 = arith.constant 0 : index
      %20 = vector.load %arg12[%c0, %c0_10] : memref<1x128xf32, #tpu.memory_space<vmem>>, vector<1x128xf32>
      tpu.vector_store %arg12[%c0, %c0_10], %19 {strides = array<i32>} : memref<1x128xf32, #tpu.memory_space<vmem>>, vector<1x128xf32>,
      %cst_11 = arith.constant 0.000000e+00 : f32
      %21 = vector.broadcast %cst_11 : f32 to vector<1x128xf32>
      %c0_12 = arith.constant 0 : index
      %c0_13 = arith.constant 0 : index
      %22 = vector.load %arg13[%c0_12, %c0_13] : memref<1x128xf32, #tpu.memory_space<vmem>>, vector<1x128xf32>
      tpu.vector_store %arg13[%c0_12, %c0_13], %21 {strides = array<i32>} : memref<1x128xf32, #tpu.memory_space<vmem>>, vector<1x128xf32>,
    } else {
    }
    %c0_i32_2 = arith.constant 0 : i32
    %5 = arith.cmpi eq, %arg0, %c0_i32_2 : i32
    %6 = arith.extui %5 : i1 to i32
    %c0_i32_3 = arith.constant 0 : i32
    %7 = arith.cmpi ne, %6, %c0_i32_3 : i32
    scf.if %7 {
      %c0 = arith.constant 0 : index
      %c0_10 = arith.constant 0 : index
      %19 = vector.load %arg2[%c0, %c0_10] : memref<128x32xbf16, #tpu.memory_space<vmem>>, vector<128x32xbf16>
      %c0_11 = arith.constant 0 : index
      %c0_12 = arith.constant 0 : index
      %20 = vector.load %arg3[%c0_11, %c0_12] : memref<32x32xbf16, #tpu.memory_space<vmem>>, vector<32x32xbf16>
      %cst = arith.constant dense<0.000000e+00> : vector<128x32xf32>
      %21 = tpu.matmul %19, %20, %cst {dimension_numbers = #tpu.dot_dimension_numbers<[1], [0], [0], [1], [0, 0, 1, 1], [], []>} : vector<128x32xbf16>, vector<32x32xbf16>, vector<128x32xf32> -> vector<128x32xf32>
      %c0_13 = arith.constant 0 : index
      %c0_14 = arith.constant 0 : index
      %22 = vector.load %arg4[%c0_13, %c0_14] : memref<1x32xf32, #tpu.memory_space<vmem>>, vector<1x32xf32>
      %23 = vector.broadcast %22 : vector<1x32xf32> to vector<128x32xf32>
      %24 = arith.addf %21, %23 : vector<128x32xf32>
      %cst_15 = arith.constant 0.000000e+00 : f32
      %25 = vector.broadcast %cst_15 : f32 to vector<128x32xf32>
      %26 = arith.maximumf %24, %25 : vector<128x32xf32>
      %c0_16 = arith.constant 0 : index
      %c0_17 = arith.constant 0 : index
      %27 = vector.load %arg5[%c0_16, %c0_17] : memref<1x32xf32, #tpu.memory_space<vmem>>, vector<1x32xf32>
      %cst_18 = arith.constant dense<0.000000e+00> : vector<1x128xf32>
      %28 = tpu.matmul %27, %26, %cst_18 {dimension_numbers = #tpu.dot_dimension_numbers<[1], [1], [0], [0], [0, 0, 1, 0], [], []>} : vector<1x32xf32>, vector<128x32xf32>, vector<1x128xf32> -> vector<1x128xf32>
      %c0_19 = arith.constant 0 : index
      %c0_20 = arith.constant 0 : index
      %29 = vector.load %arg6[%c0_19, %c0_20] : memref<1x1xf32, #tpu.memory_space<vmem>>, vector<1x1xf32>
      %30 = vector.broadcast %29 : vector<1x1xf32> to vector<1x128xf32>
      %31 = arith.addf %28, %30 : vector<1x128xf32>
      %32 = arith.index_cast %arg1 : i32 to index
      %c0_21 = arith.constant 0 : index
      %33 = vector.load %arg9[%32, %c0_21] : memref<1x128xf32, #tpu.memory_space<vmem>>, vector<1x128xf32>
      tpu.vector_store %arg9[%32, %c0_21], %31 {strides = array<i32>} : memref<1x128xf32, #tpu.memory_space<vmem>>, vector<1x128xf32>,
    } else {
    }
    %c0_i32_4 = arith.constant 0 : i32
    %8 = arith.cmpi eq, %arg1, %c0_i32_4 : i32
    %9 = arith.extui %8 : i1 to i32
    %c0_i32_5 = arith.constant 0 : i32
    %10 = arith.cmpi ne, %9, %c0_i32_5 : i32
    scf.if %10 {
      %c0 = arith.constant 0 : index
      %c0_10 = arith.constant 0 : index
      %19 = vector.load %arg2[%c0, %c0_10] : memref<128x32xbf16, #tpu.memory_space<vmem>>, vector<128x32xbf16>
      %c0_11 = arith.constant 0 : index
      %c0_12 = arith.constant 0 : index
      %20 = vector.load %arg3[%c0_11, %c0_12] : memref<32x32xbf16, #tpu.memory_space<vmem>>, vector<32x32xbf16>
      %cst = arith.constant dense<0.000000e+00> : vector<128x32xf32>
      %21 = tpu.matmul %19, %20, %cst {dimension_numbers = #tpu.dot_dimension_numbers<[1], [0], [0], [1], [0, 0, 1, 1], [], []>} : vector<128x32xbf16>, vector<32x32xbf16>, vector<128x32xf32> -> vector<128x32xf32>
      %c0_13 = arith.constant 0 : index
      %c0_14 = arith.constant 0 : index
      %22 = vector.load %arg4[%c0_13, %c0_14] : memref<1x32xf32, #tpu.memory_space<vmem>>, vector<1x32xf32>
      %23 = vector.broadcast %22 : vector<1x32xf32> to vector<128x32xf32>
      %24 = arith.addf %21, %23 : vector<128x32xf32>
      %cst_15 = arith.constant 0.000000e+00 : f32
      %25 = vector.broadcast %cst_15 : f32 to vector<128x32xf32>
      %26 = arith.maximumf %24, %25 : vector<128x32xf32>
      %c0_16 = arith.constant 0 : index
      %c0_17 = arith.constant 0 : index
      %27 = vector.load %arg5[%c0_16, %c0_17] : memref<1x32xf32, #tpu.memory_space<vmem>>, vector<1x32xf32>
      %28 = vector.broadcast %27 : vector<1x32xf32> to vector<128x32xf32>
      %29 = arith.mulf %26, %28 : vector<128x32xf32>
      %cst_18 = arith.constant dense<0.000000e+00> : vector<128xf32>
      %30 = vector.multi_reduction <add>, %29, %cst_18 [1] : vector<128x32xf32> to vector<128xf32>
      %31 = vector.shape_cast %30 : vector<128xf32> to vector<128x1xf32>
      %c0_19 = arith.constant 0 : index
      %c0_20 = arith.constant 0 : index
      %32 = vector.load %arg6[%c0_19, %c0_20] : memref<1x1xf32, #tpu.memory_space<vmem>>, vector<1x1xf32>
      %33 = vector.broadcast %32 : vector<1x1xf32> to vector<128x1xf32>
      %34 = arith.addf %31, %33 : vector<128x1xf32>
      %cst_21 = arith.constant 5.000000e+01 : f32
      %35 = vector.broadcast %cst_21 : f32 to vector<128x1xf32>
      %36 = arith.mulf %34, %35 : vector<128x1xf32>
      %c0_22 = arith.constant 0 : index
      %c0_23 = arith.constant 0 : index
      %37 = vector.load %arg11[%c0_22, %c0_23] : memref<128x1xf32, #tpu.memory_space<vmem>>, vector<128x1xf32>
      tpu.vector_store %arg11[%c0_22, %c0_23], %36 {strides = array<i32>} : memref<128x1xf32, #tpu.memory_space<vmem>>, vector<128x1xf32>,
    } else {
    }
    %11 = arith.cmpi sge, %arg1, %arg0 : i32
    %12 = arith.extui %11 : i1 to i32
    %c0_i32_6 = arith.constant 0 : i32
    %13 = arith.cmpi ne, %12, %c0_i32_6 : i32
    scf.if %13 {
      %c0 = arith.constant 0 : index
      %c0_10 = arith.constant 0 : index
      %19 = vector.load %arg11[%c0, %c0_10] : memref<128x1xf32, #tpu.memory_space<vmem>>, vector<128x1xf32>
      %20 = arith.index_cast %arg1 : i32 to index
      %c0_11 = arith.constant 0 : index
      %21 = vector.load %arg9[%20, %c0_11] : memref<1x128xf32, #tpu.memory_space<vmem>>, vector<1x128xf32>
      %cst = arith.constant 5.000000e+01 : f32
      %22 = vector.broadcast %cst : f32 to vector<1x128xf32>
      %23 = arith.mulf %21, %22 : vector<1x128xf32>
      %c0_12 = arith.constant 0 : index
      %c0_13 = arith.constant 0 : index
      %24 = vector.load %arg7[%c0_12, %c0_13] : memref<128x1xf32, #tpu.memory_space<vmem>>, vector<128x1xf32>
      %c0_14 = arith.constant 0 : index
      %c0_15 = arith.constant 0 : index
      %25 = vector.load %arg8[%c0_14, %c0_15] : memref<1x128xf32, #tpu.memory_space<vmem>>, vector<1x128xf32>
      %26 = vector.broadcast %24 : vector<128x1xf32> to vector<128x128xf32>
      %27 = vector.broadcast %25 : vector<1x128xf32> to vector<128x128xf32>
      %28 = arith.cmpf olt, %26, %27 : vector<128x128xf32>
      %29 = vector.broadcast %19 : vector<128x1xf32> to vector<128x128xf32>
      %30 = vector.broadcast %23 : vector<1x128xf32> to vector<128x128xf32>
      %31 = arith.subf %29, %30 : vector<128x128xf32>
      %32 = math.tanh %31 : vector<128x128xf32>
      %cst_16 = arith.constant 5.000000e-01 : f32
      %33 = vector.broadcast %cst_16 : f32 to vector<128x128xf32>
      %34 = arith.mulf %33, %32 : vector<128x128xf32>
      %cst_17 = arith.constant 5.000000e-01 : f32
      %35 = vector.broadcast %cst_17 : f32 to vector<128x128xf32>
      %36 = arith.addf %34, %35 : vector<128x128xf32>
      %c0_18 = arith.constant 0 : index
      %c0_19 = arith.constant 0 : index
      %37 = vector.load %arg12[%c0_18, %c0_19] : memref<1x128xf32, #tpu.memory_space<vmem>>, vector<1x128xf32>
      %cst_20 = arith.constant 0.000000e+00 : f32
      %38 = vector.broadcast %cst_20 : f32 to vector<128x128xf32>
      %39 = arith.select %28, %36, %38 : vector<128x128xi1>, vector<128x128xf32>
      %cst_21 = arith.constant dense<0.000000e+00> : vector<128xf32>
      %40 = vector.multi_reduction <add>, %39, %cst_21 [0] : vector<128x128xf32> to vector<128xf32>
      %41 = vector.shape_cast %40 : vector<128xf32> to vector<1x128xf32>
      %42 = arith.addf %37, %41 : vector<1x128xf32>
      %c0_22 = arith.constant 0 : index
      %c0_23 = arith.constant 0 : index
      %43 = vector.load %arg12[%c0_22, %c0_23] : memref<1x128xf32, #tpu.memory_space<vmem>>, vector<1x128xf32>
      tpu.vector_store %arg12[%c0_22, %c0_23], %42 {strides = array<i32>} : memref<1x128xf32, #tpu.memory_space<vmem>>, vector<1x128xf32>,
      %c0_24 = arith.constant 0 : index
      %c0_25 = arith.constant 0 : index
      %44 = vector.load %arg13[%c0_24, %c0_25] : memref<1x128xf32, #tpu.memory_space<vmem>>, vector<1x128xf32>
      %45 = arith.extui %28 : vector<128x128xi1> to vector<128x128xi32>
      %46 = arith.sitofp %45 : vector<128x128xi32> to vector<128x128xf32>
      %cst_26 = arith.constant dense<0.000000e+00> : vector<128xf32>
      %47 = vector.multi_reduction <add>, %46, %cst_26 [0] : vector<128x128xf32> to vector<128xf32>
      %48 = vector.shape_cast %47 : vector<128xf32> to vector<1x128xf32>
      %49 = arith.addf %44, %48 : vector<1x128xf32>
      %c0_27 = arith.constant 0 : index
      %c0_28 = arith.constant 0 : index
      %50 = vector.load %arg13[%c0_27, %c0_28] : memref<1x128xf32, #tpu.memory_space<vmem>>, vector<1x128xf32>
      tpu.vector_store %arg13[%c0_27, %c0_28], %49 {strides = array<i32>} : memref<1x128xf32, #tpu.memory_space<vmem>>, vector<1x128xf32>,
    } else {
    }
    %c0_i32_7 = arith.constant 0 : i32
    %14 = arith.cmpi eq, %arg0, %c0_i32_7 : i32
    %c0_i32_8 = arith.constant 0 : i32
    %15 = arith.cmpi eq, %arg1, %c0_i32_8 : i32
    %16 = arith.andi %14, %15 : i1
    %17 = arith.extui %16 : i1 to i32
    %c0_i32_9 = arith.constant 0 : i32
    %18 = arith.cmpi ne, %17, %c0_i32_9 : i32
    scf.if %18 {
      %c0 = arith.constant 0 : index
      %c0_10 = arith.constant 0 : index
      %19 = vector.load %arg12[%c0, %c0_10] : memref<1x128xf32, #tpu.memory_space<vmem>>, vector<1x128xf32>
      %20 = vector.shape_cast %19 : vector<1x128xf32> to vector<1x1x128xf32>
      %cst = arith.constant dense<0.000000e+00> : vector<1xf32>
      %21 = vector.multi_reduction <add>, %20, %cst [1, 2] : vector<1x1x128xf32> to vector<1xf32>
      %22 = vector.shape_cast %21 : vector<1xf32> to vector<1x1x1xf32>
      %23 = vector.extract %22[0, 0, 0] : f32 from vector<1x1x1xf32>
      %24 = vector.broadcast %23 : f32 to vector<1x1xf32>
      %c0_11 = arith.constant 0 : index
      %c0_12 = arith.constant 0 : index
      %25 = vector.load %arg13[%c0_11, %c0_12] : memref<1x128xf32, #tpu.memory_space<vmem>>, vector<1x128xf32>
      %26 = vector.shape_cast %25 : vector<1x128xf32> to vector<1x1x128xf32>
      %cst_13 = arith.constant dense<0.000000e+00> : vector<1xf32>
      %27 = vector.multi_reduction <add>, %26, %cst_13 [1, 2] : vector<1x1x128xf32> to vector<1xf32>
      %28 = vector.shape_cast %27 : vector<1xf32> to vector<1x1x1xf32>
      %29 = vector.extract %28[0, 0, 0] : f32 from vector<1x1x1xf32>
      %30 = vector.broadcast %29 : f32 to vector<1x1xf32>
      %cst_14 = arith.constant 0.000000e+00 : f32
      %31 = vector.broadcast %cst_14 : f32 to vector<1x1xf32>
      %32 = arith.cmpf ogt, %30, %31 : vector<1x1xf32>
      %cst_15 = arith.constant 1.000000e+00 : f32
      %33 = vector.broadcast %cst_15 : f32 to vector<1x1xf32>
      %34 = arith.maximumf %30, %33 : vector<1x1xf32>
      %35 = arith.divf %24, %34 : vector<1x1xf32>
      %cst_16 = arith.constant 0.000000e+00 : f32
      %36 = vector.broadcast %cst_16 : f32 to vector<1x1xf32>
      %37 = arith.select %32, %35, %36 : vector<1x1xi1>, vector<1x1xf32>
      %c0_17 = arith.constant 0 : index
      %c0_18 = arith.constant 0 : index
      %38 = vector.load %arg10[%c0_17, %c0_18] : memref<1x1xf32, #tpu.memory_space<vmem>>, vector<1x1xf32>
      tpu.vector_store %arg10[%c0_17, %c0_18], %37 {strides = array<i32>} : memref<1x1xf32, #tpu.memory_space<vmem>>, vector<1x1xf32>,
    } else {
    }
    return
  }
  func.func @transform_0(%arg0: i32, %arg1: i32) -> (i32, i32) {
    %c0_i32 = arith.constant 0 : i32
    %0 = arith.cmpi eq, %arg0, %c0_i32 : i32
    %1 = arith.select %0, %arg1, %arg0 : i32
    %c0_i32_0 = arith.constant 0 : i32
    %c0_i32_1 = arith.constant 0 : i32
    return %1, %c0_i32_0 : i32, i32
  }
  func.func @transform_1(%arg0: i32, %arg1: i32) -> (i32, i32) {
    %c0_i32 = arith.constant 0 : i32
    %c0_i32_0 = arith.constant 0 : i32
    %c0_i32_1 = arith.constant 0 : i32
    return %c0_i32, %c0_i32_0 : i32, i32
  }
  func.func @transform_2(%arg0: i32, %arg1: i32) -> (i32, i32) {
    %c0_i32 = arith.constant 0 : i32
    %c0_i32_0 = arith.constant 0 : i32
    %c0_i32_1 = arith.constant 0 : i32
    return %c0_i32, %c0_i32_0 : i32, i32
  }
  func.func @transform_3(%arg0: i32, %arg1: i32) -> (i32, i32) {
    %c0_i32 = arith.constant 0 : i32
    %c0_i32_0 = arith.constant 0 : i32
    %c0_i32_1 = arith.constant 0 : i32
    return %c0_i32, %c0_i32_0 : i32, i32
  }
  func.func @transform_4(%arg0: i32, %arg1: i32) -> (i32, i32) {
    %c0_i32 = arith.constant 0 : i32
    %c0_i32_0 = arith.constant 0 : i32
    %c0_i32_1 = arith.constant 0 : i32
    return %c0_i32, %c0_i32_0 : i32, i32
  }
  func.func @transform_5(%arg0: i32, %arg1: i32) -> (i32, i32) {
    %c0_i32 = arith.constant 0 : i32
    %c0_i32_0 = arith.constant 0 : i32
    return %arg0, %c0_i32 : i32, i32
  }
  func.func @transform_6(%arg0: i32, %arg1: i32) -> (i32, i32) {
    %c0_i32 = arith.constant 0 : i32
    %c0_i32_0 = arith.constant 0 : i32
    return %c0_i32, %arg1 : i32, i32
  }
  func.func @transform_7(%arg0: i32, %arg1: i32) -> (i32, i32) {
    %c0_i32 = arith.constant 0 : i32
    %c0_i32_0 = arith.constant 0 : i32
    %c0_i32_1 = arith.constant 0 : i32
    return %c0_i32, %c0_i32_0 : i32, i32
  }
  func.func @transform_8(%arg0: i32, %arg1: i32) -> (i32, i32) {
    %c0_i32 = arith.constant 0 : i32
    %c0_i32_0 = arith.constant 0 : i32
    %c0_i32_1 = arith.constant 0 : i32
    return %c0_i32, %c0_i32_0 : i32, i32
  }
}

</mosaic_0001>

<bundles_post_ra>
// kernel: tpu_custom_call.1
= control target key start
LH: loop header
LB: loop body
LE: loop exit
PB: predicated region body
PF: predicated region fallthrough
CT: control target
= control target key end

     0   :  { %s1827_s0 = inlined_call_operand.vmem [shape: bf16[128,32], index: 0, kind: input, shape index: {}]   ;;  %s1828_s1 = inlined_call_operand.vmem [shape: bf16[32,32], index: 1, kind: input, shape index: {}]   ;;  %s1829_s2 = inlined_call_operand.vmem [shape: f32[1,32], index: 2, kind: input, shape index: {}]   ;;  %s1830_s3 = inlined_call_operand.vmem [shape: f32[1,32], index: 3, kind: input, shape index: {}]   ;;  %s1831_s4 = inlined_call_operand.<no memory space> [shape: f32[1,1], index: 4, kind: input, shape index: {}]   ;;  %s1832_s5 = inlined_call_operand.vmem [shape: f32[128,1], index: 5, kind: input, shape index: {}]   ;;  %s1833_s6 = inlined_call_operand.vmem [shape: f32[1,128], index: 6, kind: input, shape index: {}]   ;;  %s1834_s7 = inlined_call_operand.hbm [shape: f32[1,128], index: 7, kind: output, shape index: {0}]   ;;  %s1835_s8 = inlined_call_operand.hbm [shape: f32[1,1], index: 8, kind: output, shape index: {1}]  }
   0x1   :  { %v14_v0 = vstv %s1831_s4 }
   0x2   :  { %15 = vst [vmem:[#allocation5] sm:$0x1] %v14_v0 }
   0x3   :  { %16 = vsyncpa [#allocation7], 0  ;;  %v1211_v1 = vld [vmem:[%s1828_s1 + $0x8] sm:$0xff]  ;;  %v1210_v3 = vld [vmem:[%s1828_s1] sm:$0xff]  ;;  %vm147_vm0 = vcmask 261120  }
   0x4   :  { %v1221_v2 = vld [vmem:[%s1828_s1 + $0x8] sm:$0xff]  ;;  %178 = vmatpush.bf16.msra.mxu0 %v1211_v1  ;;  %v1220_v4 = vld [vmem:[%s1828_s1] sm:$0xff]  ;;  %1222 = vmatpush.bf16.msra.mxu1 %v1211_v1 }
   0x5   :  { %427 = vmatpush.bf16.msra.mxu2 %v1221_v2  ;;  %1224 = vmatpush.bf16.msra.mxu3 %v1221_v2  ;;  %v1202_v5 = vld [vmem:[%s1827_s0] sm:$0xff]  ;;  %v1217_v7 = vld [vmem:[%s1827_s0 + $0x28] sm:$0xff] }
   0x6   :  { %v1212_v6 = vld [vmem:[%s1827_s0] sm:$0xff]  ;;  %v1207_v8 = vld [vmem:[%s1827_s0 + $0x28] sm:$0xff] }
   0x8   :  { %179 = vmatpush.bf16.msra.mxu0 %v1210_v3 }
   0x9   :  { %428 = vmatpush.bf16.msra.mxu2 %v1220_v4 }
   0xa   :  { %17 = vsyncpa [#allocation9], 0  ;;  %1225 = vmatpush.bf16.msra.mxu3 %v1220_v4  ;;  %1223 = vmatpush.bf16.msra.mxu1 %v1210_v3  ;;  %v1203_v9 = vld [vmem:[%s1827_s0 + $0x8] sm:$0xff]  ;;  %v1218_v11 = vld [vmem:[%s1827_s0 + $0x30] sm:$0xff]  ;;  %v1328_v19 = vmov 0   ;;  %vm590_vm6 = vcmask 7168  }
   0xb   :  { %1113 = vmatmul.msk.bf16.vlgmr.msra.gmra.mxu0 %vm147_vm0, %v1202_v5  ;;  %v1213_v10 = vld [vmem:[%s1827_s0 + $0x8] sm:$0xff]  ;;  %v1208_v12 = vld [vmem:[%s1827_s0 + $0x30] sm:$0xff]  ;;  %v1219_v15 = vld [vmem:[%s1827_s0 + $0x38] sm:$0xff]  ;;  %1234 = vset.pattern.permute.xlu1 %v1328_v19  ;;  %s1042_s15 = sshll.u32 %s1834_s7, 4  ;;  %s1331_s17 = smov [#allocation8]   ;;  %s1043_s15 = int_to_ptr.hbm [resolvable:$true] %s1042_s15 }
   0xc   :  { %1178 = vmatmul.msk.bf16.vlgmr.msra.gmra.mxu2 %vm147_vm0, %v1212_v6  ;;  %v1204_v13 = vld [vmem:[%s1827_s0 + $0x10] sm:$0xff]  ;;  %v1209_v16 = vld [vmem:[%s1827_s0 + $0x38] sm:$0xff]  ;;  %v238_v17 = vld [vmem:[#allocation5] sm:$0x1]  ;;  %1235 = vset.pattern.permute.xlu0 %v1328_v19  ;;  %s1053_s20 = sshll.u32 %s1835_s8, 4  ;;  %s1054_s20 = int_to_ptr.hbm [resolvable:$true] %s1053_s20 }
   0xd   :  { %1183 = vmatmul.msk.bf16.vlgmr.msra.gmra.mxu3 %vm147_vm0, %v1217_v7  ;;  %1118 = vmatmul.msk.bf16.vlgmr.msra.gmra.mxu1 %vm147_vm0, %v1207_v8  ;;  %v1214_v14 = vld [vmem:[%s1827_s0 + $0x10] sm:$0xff]  ;;  %v630_v18 = vld [vmem:[%s1832_s5 + $0x8] sm:$0xff]  ;;  %v632_v20 = vld [vmem:[%s1832_s5 + $0x18] sm:$0xff] }
   0xe   :  { %241 = vperm.xlu1 %1234, %v238_v17   ;;  %653 = vperm.xlu0 %1235, %v630_v18   ;;  %v629_v21 = vld [vmem:[%s1832_s5] sm:$0xff]  ;;  %v635_v23 = vld [vmem:[%s1832_s5 + $0x30] sm:$0xff]  ;;  %v1205_v24 = vld [vmem:[%s1827_s0 + $0x18] sm:$0xff] }
   0xf   :  { %1236 = vset.pattern.permute.xlu2 %v1328_v19  ;;  %v633_v22 = vld [vmem:[%s1832_s5 + $0x20] sm:$0xff]  ;;  %v1215_v25 = vld [vmem:[%s1827_s0 + $0x18] sm:$0xff]  ;;  %v631_v26 = vld [vmem:[%s1832_s5 + $0x10] sm:$0xff]  ;;  %v1329_v19 = vmov 0.0  }
  0x10   :  { %663 = vperm.xlu2 %1236, %v632_v20   ;;  %v636_v27 = vld [vmem:[%s1832_s5 + $0x38] sm:$0xff]  ;;  %v634_v28 = vld [vmem:[%s1832_s5 + $0x28] sm:$0xff]  ;;  %v1206_v29 = vld [vmem:[%s1827_s0 + $0x20] sm:$0xff]  ;;  %66 = vst [vmem:[#allocation3] sm:$0x1] %v1329_v19 }
  0x11   :  { %v1216_v30 = vld [vmem:[%s1827_s0 + $0x20] sm:$0xff]  ;;  %67 = vst [vmem:[#allocation4] sm:$0x1] %v1329_v19  ;;  %s1051_s0 = sshll.u32 %s1331_s17, 4  ;;  %s1052_s0 = int_to_ptr.vmem [resolvable:$true] %s1051_s0 }
  0x12   :  { %v1487_v33 = vld [vmem:[%s1829_s2] ss:$0 sm:$0xff] }
  0x13   :  { %v1493_v37 = vld [vmem:[%s1830_s3] ss:$0 sm:$0xff] }
  0x14   :  { %v1532_v17 = vld [vmem:[%s1833_s6] ss:$0 sm:$0xff] }
  0x16   :  { %648 = vperm.xlu1 %1234, %v629_v21   ;;  %668 = vperm.xlu0 %1235, %v633_v22   ;;  %v1542_v21 = vld [vmem:[%s1829_s2] ss:$0 sm:$0xff] }
  0x18   :  { %678 = vperm.xlu2 %1236, %v635_v23  }
  0x1b   :  { %1114 = vmatmul.msk.bf16.gmra.mxu0 %vm147_vm0, %v1203_v9 }
  0x1c   :  { %1179 = vmatmul.msk.bf16.gmra.mxu2 %vm147_vm0, %v1213_v10 }
  0x1d   :  { %1184 = vmatmul.msk.bf16.gmra.mxu3 %vm147_vm0, %v1218_v11  ;;  %1119 = vmatmul.msk.bf16.gmra.mxu1 %vm147_vm0, %v1208_v12 }
  0x1e   :  { %658 = vperm.xlu1 %1234, %v631_v26   ;;  %683 = vperm.xlu0 %1235, %v636_v27  }
  0x26   :  { %673 = vperm.xlu1 %1234, %v634_v28  }
  0x2b   :  { %1115 = vmatmul.msk.bf16.gmra.mxu0 %vm147_vm0, %v1204_v13 }
  0x2c   :  { %1180 = vmatmul.msk.bf16.gmra.mxu2 %vm147_vm0, %v1214_v14 }
  0x2d   :  { %1185 = vmatmul.msk.bf16.gmra.mxu3 %vm147_vm0, %v1219_v15  ;;  %1120 = vmatmul.msk.bf16.gmra.mxu1 %vm147_vm0, %v1209_v16 }
  0x3b   :  { %1116 = vmatmul.msk.bf16.gmra.mxu0 %vm147_vm0, %v1205_v24 }
  0x3c   :  { %1181 = vmatmul.msk.bf16.gmra.mxu2 %vm147_vm0, %v1215_v25 }
  0x4b   :  { %1117 = vmatmul.msk.bf16.gmra.mxu0 %vm147_vm0, %v1206_v29 }
  0x4c   :  { %1182 = vmatmul.msk.bf16.gmra.mxu2 %vm147_vm0, %v1216_v30 }
  0x80   :  { %v1519_v4 = vpop.permute.xlu1 %241 }
  0x88   :  { %v1480_v31 = vpop.f32.mrf.mxu0  ;;  %v1534_v18 = vpop.permute.xlu1 %648 }
  0x89   :  { %vm729_vm1 = vcmp.lt.f32.partialorder %v1534_v18, %v1532_v17 }
  0x8a   :  { %v1482_v32 = vpop.f32.mrf.mxu1 }
  0x8f   :  { %v430_v34 = vpop.f32.mrf.mxu2 }
  0x90   :  { %v431_v35 = vadd.f32 %v1487_v33, %v430_v34  ;;  %v455_v36 = vpop.f32.mrf.mxu3  ;;  %v1496_v39 = vpop.f32.mrf.mxu0 }
  0x91   :  { %v456_v38 = vadd.f32 %v1487_v33, %v455_v36  ;;  %v1557_v36 = vpop.permute.xlu0 %653 }
  0x92   :  { %v470_v40 = vmax.f32 %v431_v35, 0.0  ;;  %v1498_v41 = vpop.f32.mrf.mxu1  ;;  %v1186_v35 = vsel %vm729_vm1, 1.0, %v1329_v19  ;;  %vm730_vm2 = vcmp.lt.f32.partialorder %v1557_v36, %v1532_v17 }
  0x93   :  { %v480_v42 = vmax.f32 %v456_v38, 0.0 }
  0x94   :  { %v490_v43 = vmul.f32 %v1493_v37, %v470_v40 }
  0x95   :  { %v500_v44 = vmul.f32 %v1493_v37, %v480_v42 }
  0x96   :  { %v506_v45 = vsel %vm147_vm0, %v490_v43, 0.0  ;;  %v1563_v43 = vpop.permute.xlu1 %658 }
  0x97   :  { %v432_v46 = vpop.f32.mrf.mxu2  ;;  %507 = vadd.xlane.f32.xlu0 %v506_v45  ;;  %v536_v47 = vsel %vm147_vm0, %v500_v44, 0.0  ;;  %v1187_v45 = vsel %vm730_vm2, 1.0, %v1329_v19  ;;  %vm731_vm3 = vcmp.lt.f32.partialorder %v1563_v43, %v1532_v17 }
  0x98   :  { %v433_v48 = vadd.f32 %v1487_v33, %v432_v46  ;;  %v457_v49 = vpop.f32.mrf.mxu3  ;;  %537 = vadd.xlane.f32.xlu1 %v536_v47  ;;  %v1506_v51 = vpop.f32.mrf.mxu0  ;;  %v965_v47 = vadd.f32 %v1187_v45, %v1186_v35 }
  0x99   :  { %v458_v50 = vadd.f32 %v1487_v33, %v457_v49 }
  0x9a   :  { %v471_v52 = vmax.f32 %v433_v48, 0.0  ;;  %v1508_v53 = vpop.f32.mrf.mxu1  ;;  %v1188_v48 = vsel %vm731_vm3, 1.0, %v1329_v19 }
  0x9b   :  { %v481_v54 = vmax.f32 %v458_v50, 0.0 }
  0x9c   :  { %v491_v55 = vmul.f32 %v1493_v37, %v471_v52 }
  0x9d   :  { %v501_v56 = vmul.f32 %v1493_v37, %v481_v54 }
  0x9e   :  { %v509_v57 = vsel %vm147_vm0, %v491_v55, 0.0 }
  0x9f   :  { %v435_v58 = vpop.f32.mrf.mxu2  ;;  %510 = vadd.xlane.f32.xlu0 %v509_v57  ;;  %v539_v59 = vsel %vm147_vm0, %v501_v56, 0.0  ;;  %v966_v56 = vadd.f32 %v1188_v48, %v965_v47 }
  0xa0   :  { %v460_v60 = vpop.f32.mrf.mxu3  ;;  %v436_v61 = vadd.f32 %v1487_v33, %v435_v58  ;;  %540 = vadd.xlane.f32.xlu2 %v539_v59  ;;  %v1516_v63 = vpop.f32.mrf.mxu0 }
  0xa1   :  { %v461_v62 = vadd.f32 %v1487_v33, %v460_v60  ;;  %v1580_v59 = vpop.permute.xlu2 %663 }
  0xa2   :  { %v472_v0 = vmax.f32 %v436_v61, 0.0  ;;  %v213_v1 = vpop.f32.mrf.mxu1  ;;  %vm732_vm4 = vcmp.lt.f32.partialorder %v1580_v59, %v1532_v17  ;;  %v212_v61 = vadd.f32 %v1542_v21, %v1508_v53 }
  0xa3   :  { %v482_v2 = vmax.f32 %v461_v62, 0.0  ;;  %v214_v50 = vadd.f32 %v1542_v21, %v213_v1  ;;  %v1591_v1 = vpop.permute.xlu0 %668 }
  0xa4   :  { %v492_v3 = vmul.f32 %v1493_v37, %v472_v0  ;;  %v1189_v0 = vsel %vm732_vm4, 1.0, %v1329_v19  ;;  %vm733_vm5 = vcmp.lt.f32.partialorder %v1591_v1, %v1532_v17 }
  0xa5   :  { %v502_v5 = vmul.f32 %v1493_v37, %v482_v2  ;;  %v234_v2 = vmax.f32 %v214_v50, 0.0  ;;  %v1190_v53 = vsel %vm733_vm5, 1.0, %v1329_v19 }
  0xa6   :  { %v512_v6 = vsel %vm147_vm0, %v492_v3, 0.0 }
  0xa7   :  { %v437_v7 = vpop.f32.mrf.mxu2  ;;  %513 = vadd.xlane.f32.xlu1 %v512_v6  ;;  %v542_v8 = vsel %vm147_vm0, %v502_v5, 0.0  ;;  %v967_v5 = vadd.f32 %v1189_v0, %v966_v56 }
  0xa8   :  { %v462_v9 = vpop.f32.mrf.mxu3  ;;  %v438_v10 = vadd.f32 %v1487_v33, %v437_v7  ;;  %543 = vadd.xlane.f32.xlu0 %v542_v8  ;;  %v1526_v12 = vpop.f32.mrf.mxu0 }
  0xa9   :  { %v463_v11 = vadd.f32 %v1487_v33, %v462_v9  ;;  %v1602_v8 = vadd.f32 %v1190_v53, %v967_v5 }
  0xaa   :  { %v473_v13 = vmax.f32 %v438_v10, 0.0  ;;  %v216_v14 = vpop.f32.mrf.mxu1 }
  0xab   :  { %v483_v15 = vmax.f32 %v463_v11, 0.0  ;;  %v217_v30 = vadd.f32 %v1542_v21, %v216_v14  ;;  %v209_v11 = vadd.f32 %v1542_v21, %v1498_v41 }
  0xac   :  { %v493_v16 = vmul.f32 %v1493_v37, %v473_v13  ;;  %v233_v13 = vmax.f32 %v212_v61, 0.0 }
  0xad   :  { %v503_v25 = vmul.f32 %v1493_v37, %v483_v15  ;;  %v235_v52 = vmax.f32 %v217_v30, 0.0 }
  0xae   :  { %v515_v20 = vsel %vm147_vm0, %v493_v16, 0.0 }
  0xaf   :  { %v440_v22 = vpop.f32.mrf.mxu2  ;;  %516 = vadd.xlane.f32.xlu1 %v515_v20  ;;  %v545_v42 = vsel %vm147_vm0, %v503_v25, 0.0 }
  0xb0   :  { %v441_v23 = vadd.f32 %v1487_v33, %v440_v22  ;;  %v465_v24 = vpop.f32.mrf.mxu3  ;;  %v1549_v27 = vpop.f32.mrf.mxu0  ;;  %v207_v22 = vadd.f32 %v1542_v21, %v1482_v32 }
  0xb1   :  { %v466_v26 = vadd.f32 %v1487_v33, %v465_v24 }
  0xb2   :  { %v474_v28 = vmax.f32 %v441_v23, 0.0  ;;  %v218_v29 = vpop.f32.mrf.mxu1  ;;  %v232_v23 = vmax.f32 %v209_v11, 0.0 }
  0xb3   :  { %v219_v34 = vadd.f32 %v1542_v21, %v218_v29  ;;  %v484_v38 = vmax.f32 %v466_v26, 0.0 }
  0xb4   :  { %v494_v40 = vmul.f32 %v1493_v37, %v474_v28  ;;  %v231_v28 = vmax.f32 %v207_v22, 0.0 }
  0xb5   :  { %v236_v44 = vmax.f32 %v219_v34, 0.0  ;;  %v504_v55 = vmul.f32 %v1493_v37, %v484_v38 }
  0xb6   :  { %v518_v46 = vsel %vm147_vm0, %v494_v40, 0.0 }
  0xb7   :  { %v442_v49 = vpop.f32.mrf.mxu2  ;;  %519 = vadd.xlane.f32.xlu2 %v518_v46  ;;  %546 = vadd.xlane.f32.xlu1 %v545_v42  ;;  %v548_v3 = vsel %vm147_vm0, %v504_v55, 0.0 }
  0xb8   :  { %v467_v54 = vpop.f32.mrf.mxu3  ;;  %1121 = vmatpush.xpose.msk.msrb.mxu1 %vm147_vm0, %v236_v44  ;;  %v196_v58 = vpop.f32.mrf.mxu0  ;;  %v443_v60 = vadd.f32 %v1487_v33, %v442_v49 }
  0xb9   :  { %v468_v57 = vadd.f32 %v1487_v33, %v467_v54  ;;  %v197_v56 = vadd.f32 %v1542_v21, %v196_v58 }
  0xba   :  { %v475_v7 = vmax.f32 %v443_v60, 0.0 }
  0xbb   :  { %v485_v62 = vmax.f32 %v468_v57, 0.0  ;;  %v227_v0 = vmax.f32 %v197_v56, 0.0 }
  0xbc   :  { %1122 = vmatpush.xpose.msk.msrb.mxu1 %vm147_vm0, %v235_v52  ;;  %v495_v20 = vmul.f32 %v1493_v37, %v475_v7 }
  0xbd   :  { %v505_v6 = vmul.f32 %v1493_v37, %v485_v62  ;;  %v194_v62 = vadd.f32 %v1542_v21, %v1549_v27  ;;  %v187_v27 = vadd.f32 %v1542_v21, %v1506_v51  ;;  %v237_v51 = vld [vmem:[%s1830_s3] sm:$0x1] }
  0xbe   :  { %v521_v41 = vsel %vm147_vm0, %v495_v20, 0.0 }
  0xbf   :  { %v445_v9 = vpop.f32.mrf.mxu2  ;;  %549 = vadd.xlane.f32.xlu2 %v548_v3  ;;  %v551_v10 = vsel %vm147_vm0, %v505_v6, 0.0  ;;  %v226_v3 = vmax.f32 %v194_v62, 0.0  ;;  %v184_v6 = vadd.f32 %v1542_v21, %v1496_v39  ;;  %v223_v53 = vmax.f32 %v187_v27, 0.0  ;;  %v1659_v39 = vpop.permute.xlu1 %673 }
  0xc0   :  { %v446_v14 = vadd.f32 %v1487_v33, %v445_v9  ;;  %552 = vadd.xlane.f32.xlu0 %v551_v10  ;;  %1123 = vmatpush.xpose.msk.msrb.mxu1 %vm147_vm0, %v234_v2  ;;  %v198_v15 = vpop.f32.mrf.mxu0  ;;  %v1657_v9 = vpop.permute.xlu0 %683  ;;  %v1661_v10 = vld [vmem:[#allocation5] ss:$0 sm:$0xff]  ;;  %vm734_vm7 = vcmp.lt.f32.partialorder %v1659_v39, %v1532_v17 }
  0xc1   :  { %v199_v49 = vadd.f32 %v1542_v21, %v198_v15  ;;  %v222_v7 = vmax.f32 %v184_v6, 0.0  ;;  %vm736_vm9 = vcmp.lt.f32.partialorder %v1657_v9, %v1532_v17 }
  0xc2   :  { %v476_v16 = vmax.f32 %v446_v14, 0.0 }
  0xc3   :  { %v228_v57 = vmax.f32 %v199_v49, 0.0 }
  0xc4   :  { %v496_v24 = vmul.f32 %v1493_v37, %v476_v16  ;;  %1124 = vmatpush.xpose.msk.msrb.mxu1 %vm147_vm0, %v233_v13 }
  0xc6   :  { %v524_v25 = vsel %vm147_vm0, %v496_v24, 0.0 }
  0xc7   :  { %v447_v26 = vpop.f32.mrf.mxu2  ;;  %522 = vadd.xlane.f32.xlu2 %v521_v41 }
  0xc8   :  { %v448_v29 = vadd.f32 %v1487_v33, %v447_v26  ;;  %525 = vadd.xlane.f32.xlu0 %v524_v25  ;;  %1125 = vmatpush.xpose.msk.msrb.mxu1 %vm147_vm0, %v232_v23  ;;  %v201_v30 = vpop.f32.mrf.mxu0 }
  0xc9   :  { %v202_v44 = vadd.f32 %v1542_v21, %v201_v30 }
  0xca   :  { %v477_v34 = vmax.f32 %v448_v29, 0.0 }
  0xcb   :  { %v229_v50 = vmax.f32 %v202_v44, 0.0 }
  0xcc   :  { %v497_v32 = vmul.f32 %v1493_v37, %v477_v34  ;;  %1126 = vmatpush.xpose.msk.msrb.mxu1 %vm147_vm0, %v231_v28 }
  0xce   :  { %v527_v35 = vsel %vm147_vm0, %v497_v32, 0.0 }
  0xcf   :  { %v450_v38 = vpop.f32.mrf.mxu2  ;;  %528 = vadd.xlane.f32.xlu1 %v527_v35 }
  0xd0   :  { %v451_v40 = vadd.f32 %v1487_v33, %v450_v38  ;;  %v203_v42 = vpop.f32.mrf.mxu0 }
  0xd1   :  { %v204_v46 = vadd.f32 %v1542_v21, %v203_v42 }
  0xd2   :  { %v478_v45 = vmax.f32 %v451_v40, 0.0 }
  0xd3   :  { %v230_v47 = vmax.f32 %v204_v46, 0.0 }
  0xd4   :  { %v498_v48 = vmul.f32 %v1493_v37, %v478_v45 }
  0xd5   :  { %1127 = vmatpush.xpose.msk.msrb.mxu1 %vm147_vm0, %v230_v47 }
  0xd6   :  { %v530_v52 = vsel %vm147_vm0, %v498_v48, 0.0 }
  0xd7   :  { %v452_v54 = vpop.f32.mrf.mxu2  ;;  %531 = vadd.xlane.f32.xlu2 %v530_v52 }
  0xd8   :  { %v453_v55 = vadd.f32 %v1487_v33, %v452_v54  ;;  %v192_v33 = vadd.f32 %v1542_v21, %v1526_v12  ;;  %v182_v12 = vadd.f32 %v1542_v21, %v1480_v31  ;;  %v1663_v31 = vpop.permute.xlu2 %678 }
  0xd9   :  { %1128 = vmatpush.xpose.msk.msrb.mxu1 %vm147_vm0, %v229_v50  ;;  %vm735_vm8 = vcmp.lt.f32.partialorder %v1663_v31, %v1532_v17 }
  0xda   :  { %v479_v60 = vmax.f32 %v453_v55, 0.0  ;;  %v225_v58 = vmax.f32 %v192_v33, 0.0 }
  0xdc   :  { %v499_v61 = vmul.f32 %v1493_v37, %v479_v60  ;;  %v189_v37 = vadd.f32 %v1542_v21, %v1516_v63  ;;  %v221_v63 = vmax.f32 %v182_v12, 0.0 }
  0xdd   :  { %1129 = vmatpush.xpose.msk.msrb.mxu1 %vm147_vm0, %v228_v57 }
  0xde   :  { %v533_v2 = vsel %vm147_vm0, %v499_v61, 0.0  ;;  %v224_v5 = vmax.f32 %v189_v37, 0.0 }
  0xdf   :  { %534 = vadd.xlane.f32.xlu0 %v533_v2 }
  0xe1   :  { %1130 = vmatpush.xpose.msk.msrb.mxu1 %vm147_vm0, %v227_v0 }
  0xe5   :  { %1131 = vmatpush.xpose.msk.msrb.mxu1 %vm147_vm0, %v226_v3 }
  0xe9   :  { %1132 = vmatpush.xpose.msk.msrb.mxu1 %vm147_vm0, %v225_v58 }
  0xed   :  { %1133 = vmatpush.xpose.msk.msrb.mxu1 %vm147_vm0, %v224_v5 }
  0xf1   :  { %1134 = vmatpush.xpose.msk.msrb.mxu1 %vm147_vm0, %v223_v53 }
  0xf5   :  { %1135 = vmatpush.xpose.msk.msrb.mxu1 %vm147_vm0, %v222_v7 }
  0xf9   :  { %1136 = vmatpush.xpose.msk.msrb.mxu1 %vm147_vm0, %v221_v63 }
  0xfc   :  { %1137 = vmatmul.msk.f32.vlgmr.msrb.gmra.mxu1 %vm147_vm0, %v237_v51 }
 0x10a   :  { %v508_v11 = vpop.xlane.xlu0 %507 }
 0x10b   :  { %v558_v21 = vadd.f32 %v1661_v10, %v508_v11  ;;  %v538_v13 = vpop.xlane.xlu1 %537 }
 0x10c   :  { %v568_v14 = vadd.f32 %v1661_v10, %v538_v13 }
 0x10d   :  { %v574_v15 = vmul.f32 50.0, %v558_v21 }
 0x10e   :  { %v584_v16 = vmul.f32 50.0, %v568_v14  ;;  %v637_v14 = vld [vmem:[%s1832_s5 + $0x40] sm:$0xff] }
 0x10f   :  { %591 = vst.msk [vmem:[#allocation2] sm:$0xff] %vm590_vm6, %v574_v15 }
 0x110   :  { %601 = vst.msk [vmem:[#allocation2 + $0x50] sm:$0xff] %vm590_vm6, %v584_v16 }
 0x112   :  { %v511_v20 = vpop.xlane.xlu0 %510 }
 0x113   :  { %v559_v22 = vadd.f32 %v1661_v10, %v511_v20  ;;  %v541_v23 = vpop.xlane.xlu2 %540 }
 0x114   :  { %v569_v24 = vadd.f32 %v1661_v10, %v541_v23 }
 0x115   :  { %v575_v41 = vmul.f32 50.0, %v559_v22 }
 0x116   :  { %v611_v25 = vld [vmem:[#allocation2] sm:$0xff]  ;;  %v585_v26 = vmul.f32 50.0, %v569_v24 }
 0x117   :  { %592 = vst.msk [vmem:[#allocation2 + $0x8] sm:$0xff] %vm590_vm6, %v575_v41  ;;  %747 = vperm.xlu2 %1236, %v611_v25   ;;  %v621_v32 = vld [vmem:[#allocation2 + $0x50] sm:$0xff]  ;;  %v638_v25 = vld [vmem:[%s1832_s5 + $0x48] sm:$0xff] }
 0x118   :  { %602 = vst.msk [vmem:[#allocation2 + $0x58] sm:$0xff] %vm590_vm6, %v585_v26 }
 0x11a   :  { %v514_v28 = vpop.xlane.xlu1 %513 }
 0x11b   :  { %v560_v29 = vadd.f32 %v1661_v10, %v514_v28  ;;  %v544_v30 = vpop.xlane.xlu0 %543 }
 0x11c   :  { %v570_v34 = vadd.f32 %v1661_v10, %v544_v30 }
 0x11d   :  { %v576_v35 = vmul.f32 50.0, %v560_v29  ;;  %v640_v29 = vld [vmem:[%s1832_s5 + $0x58] sm:$0xff] }
 0x11e   :  { %v586_v38 = vmul.f32 50.0, %v570_v34  ;;  %v612_v40 = vld [vmem:[#allocation2 + $0x8] sm:$0xff] }
 0x11f   :  { %593 = vst.msk [vmem:[#allocation2 + $0x10] sm:$0xff] %vm590_vm6, %v576_v35  ;;  %797 = vperm.xlu2 %1236, %v621_v32   ;;  %752 = vperm.xlu0 %1235, %v612_v40   ;;  %v622_v45 = vld [vmem:[#allocation2 + $0x58] sm:$0xff]  ;;  %v642_v34 = vld [vmem:[%s1832_s5 + $0x68] sm:$0xff]  ;;  %v641_v32 = vld [vmem:[%s1832_s5 + $0x60] sm:$0xff] }
 0x120   :  { %603 = vst.msk [vmem:[#allocation2 + $0x60] sm:$0xff] %vm590_vm6, %v586_v38  ;;  %v643_v35 = vld [vmem:[%s1832_s5 + $0x70] sm:$0xff]  ;;  %v644_v38 = vld [vmem:[%s1832_s5 + $0x78] sm:$0xff] }
 0x122   :  { %v517_v42 = vpop.xlane.xlu1 %516 }
 0x123   :  { %v561_v44 = vadd.f32 %v1661_v10, %v517_v42  ;;  %v244_v42 = vperm.slane %v1519_v4, 0 }
 0x125   :  { %v577_v46 = vmul.f32 50.0, %v561_v44 }
 0x126   :  { %v613_v47 = vld [vmem:[#allocation2 + $0x10] sm:$0xff] }
 0x127   :  { %594 = vst.msk [vmem:[#allocation2 + $0x18] sm:$0xff] %vm590_vm6, %v577_v46  ;;  %757 = vperm.xlu2 %1236, %v613_v47   ;;  %802 = vperm.xlu0 %1235, %v622_v45   ;;  %v623_v48 = vld [vmem:[#allocation2 + $0x60] sm:$0xff] }
 0x128   :  { %807 = vperm.xlu1 %1234, %v623_v48  }
 0x12a   :  { %v520_v49 = vpop.xlane.xlu2 %519  ;;  %v547_v50 = vpop.xlane.xlu1 %546 }
 0x12b   :  { %v562_v52 = vadd.f32 %v1661_v10, %v520_v49  ;;  %v571_v54 = vadd.f32 %v1661_v10, %v547_v50 }
 0x12d   :  { %v578_v55 = vmul.f32 50.0, %v562_v52  ;;  %v587_v56 = vmul.f32 50.0, %v571_v54 }
 0x12e   :  { %v614_v57 = vld [vmem:[#allocation2 + $0x18] sm:$0xff] }
 0x12f   :  { %595 = vst.msk [vmem:[#allocation2 + $0x20] sm:$0xff] %vm590_vm6, %v578_v55 }
 0x130   :  { %604 = vst.msk [vmem:[#allocation2 + $0x68] sm:$0xff] %vm590_vm6, %v587_v56  ;;  %762 = vperm.xlu1 %1234, %v614_v57  }
 0x132   :  { %v550_v60 = vpop.xlane.xlu2 %549 }
 0x133   :  { %v572_v61 = vadd.f32 %v1661_v10, %v550_v60  ;;  %v553_v62 = vpop.xlane.xlu0 %552 }
 0x134   :  { %v573_v0 = vadd.f32 %v1661_v10, %v553_v62 }
 0x135   :  { %v588_v2 = vmul.f32 50.0, %v572_v61 }
 0x136   :  { %v589_v3 = vmul.f32 50.0, %v573_v0  ;;  %v615_v33 = vld [vmem:[#allocation2 + $0x20] sm:$0xff] }
 0x137   :  { %605 = vst.msk [vmem:[#allocation2 + $0x70] sm:$0xff] %vm590_vm6, %v588_v2  ;;  %767 = vperm.xlu2 %1236, %v615_v33   ;;  %v624_v41 = vld [vmem:[#allocation2 + $0x68] sm:$0xff] }
 0x138   :  { %606 = vst.msk [vmem:[#allocation2 + $0x78] sm:$0xff] %vm590_vm6, %v589_v3 }
 0x13a   :  { %v523_v37 = vpop.xlane.xlu2 %522 }
 0x13b   :  { %v563_v58 = vadd.f32 %v1661_v10, %v523_v37  ;;  %v526_v27 = vpop.xlane.xlu0 %525 }
 0x13c   :  { %v564_v5 = vadd.f32 %v1661_v10, %v526_v27 }
 0x13d   :  { %v579_v6 = vmul.f32 50.0, %v563_v58 }
 0x13e   :  { %v580_v53 = vmul.f32 50.0, %v564_v5  ;;  %v625_v26 = vld [vmem:[#allocation2 + $0x70] sm:$0xff] }
 0x13f   :  { %596 = vst.msk [vmem:[#allocation2 + $0x28] sm:$0xff] %vm590_vm6, %v579_v6  ;;  %v626_v30 = vld [vmem:[#allocation2 + $0x78] sm:$0xff] }
 0x140   :  { %597 = vst.msk [vmem:[#allocation2 + $0x30] sm:$0xff] %vm590_vm6, %v580_v53 }
 0x142   :  { %v529_v12 = vpop.xlane.xlu1 %528 }
 0x143   :  { %v565_v7 = vadd.f32 %v1661_v10, %v529_v12 }
 0x145   :  { %v581_v63 = vmul.f32 50.0, %v565_v7 }
 0x146   :  { %v616_v51 = vld [vmem:[#allocation2 + $0x28] sm:$0xff] }
 0x147   :  { %598 = vst.msk [vmem:[#allocation2 + $0x38] sm:$0xff] %vm590_vm6, %v581_v63  ;;  %772 = vperm.xlu1 %1234, %v616_v51   ;;  %v617_v11 = vld [vmem:[#allocation2 + $0x30] sm:$0xff] }
 0x148   :  { %777 = vperm.xlu2 %1236, %v617_v11  }
 0x14a   :  { %v532_v21 = vpop.xlane.xlu2 %531 }
 0x14b   :  { %v566_v13 = vadd.f32 %v1661_v10, %v532_v21 }
 0x14d   :  { %v582_v15 = vmul.f32 50.0, %v566_v13 }
 0x14e   :  { %v618_v16 = vld [vmem:[#allocation2 + $0x38] sm:$0xff] }
 0x14f   :  { %599 = vst.msk [vmem:[#allocation2 + $0x40] sm:$0xff] %vm590_vm6, %v582_v15  ;;  %688 = vperm.xlu1 %1234, %v637_v14  }
 0x150   :  { %782 = vperm.xlu2 %1236, %v618_v16  }
 0x152   :  { %v535_v20 = vpop.xlane.xlu0 %534 }
 0x153   :  { %v567_v22 = vadd.f32 %v1661_v10, %v535_v20  ;;  %v639_v10 = vld [vmem:[%s1832_s5 + $0x50] sm:$0xff]  ;;  %s1330_s5 = smov [#allocation6]  }
 0x154   :  { %s1040_s13 = sshll.u32 %s1330_s5, 4  ;;  %s1041_s13 = int_to_ptr.vmem [resolvable:$true] %s1040_s13 }
 0x155   :  { %v583_v23 = vmul.f32 50.0, %v567_v22 }
 0x156   :  { %v619_v24 = vld [vmem:[#allocation2 + $0x40] sm:$0xff] }
 0x157   :  { %600 = vst.msk [vmem:[#allocation2 + $0x48] sm:$0xff] %vm590_vm6, %v583_v23  ;;  %787 = vperm.xlu0 %1235, %v619_v24  }
 0x158   :  { %812 = vperm.xlu2 %1236, %v624_v41  }
 0x15e   :  { %v620_v28 = vld [vmem:[#allocation2 + $0x48] sm:$0xff] }
 0x15f   :  { %817 = vperm.xlu0 %1235, %v625_v26   ;;  %792 = vperm.xlu1 %1234, %v620_v28  }
 0x160   :  { %693 = vperm.xlu2 %1236, %v638_v25  }
 0x167   :  { %698 = vperm.xlu0 %1235, %v639_v10   ;;  %822 = vperm.xlu1 %1234, %v626_v30  }
 0x168   :  { %703 = vperm.xlu2 %1236, %v640_v29  }
 0x16f   :  { %713 = vperm.xlu0 %1235, %v642_v34   ;;  %708 = vperm.xlu1 %1234, %v641_v32   ;;  %v1191_v34 = vsel %vm734_vm7, 1.0, %v1329_v19 }
 0x170   :  { %718 = vperm.xlu2 %1236, %v643_v35  }
 0x171   :  { %v748_v40 = vpop.permute.xlu2 %747 }
 0x177   :  { %723 = vperm.xlu1 %1234, %v644_v38   ;;  %v969_v38 = vadd.f32 %v1191_v34, %v1602_v8  ;;  %v1193_v8 = vsel %vm736_vm9, 1.0, %v1329_v19 }
 0x179   :  { %v313_v44 = vpop.f32.mrf.mxu1  ;;  %v1722_v46 = vpop.permute.xlu2 %797 }
 0x17a   :  { %v314_v45 = vadd.f32 %v313_v44, %v244_v42  ;;  %v1192_v44 = vsel %vm735_vm8, 1.0, %v1329_v19 }
 0x17c   :  { %316 = vst [vmem:[#allocation6] sm:$0x1] %v314_v45 }
 0x17d   :  { %1045 = dma.vmem_to_hbm [thread:$0]  %s1041_s13, 16, %s1043_s15, [#allocation7]  }
 0x181   :  { %v758_v52 = vpop.permute.xlu2 %757 }
 0x183   :  { %v627_v47 = vld [vmem:[#allocation6] sm:$0x1] }
 0x184   :  { %v628_v48 = vmul.f32 50.0, %v627_v47 }
 0x186   :  { %v1724_v49 = vperm.slane %v628_v48, 0 }
 0x188   :  { %v828_v50 = vsub.f32 %v748_v40, %v1724_v49  ;;  %v830_v54 = vsub.f32 %v758_v52, %v1724_v49  ;;  %v838_v42 = vsub.f32 %v1722_v46, %v1724_v49  ;;  %v970_v52 = vadd.f32 %v1192_v44, %v969_v38 }
 0x18a   :  { %1242 = vtanh.f32 %v828_v50 }
 0x18b   :  { %1244 = vtanh.f32 %v830_v54 }
 0x190   :  { %v1243_v4 = vpop.eup %1242 }
 0x191   :  { %v753_v55 = vpop.permute.xlu0 %752  ;;  %v1245_v57 = vpop.eup %1244  ;;  %v860_v60 = vmul.f32 0.5, %v1243_v4 }
 0x192   :  { %v829_v56 = vsub.f32 %v753_v55, %v1724_v49  ;;  %v862_v61 = vmul.f32 0.5, %v1245_v57  ;;  %v768_v62 = vpop.permute.xlu2 %767 }
 0x193   :  { %v876_v33 = vadd.f32 0.5, %v860_v60  ;;  %v832_v37 = vsub.f32 %v768_v62, %v1724_v49 }
 0x194   :  { %1246 = vtanh.f32 %v829_v56  ;;  %v878_v58 = vadd.f32 0.5, %v862_v61 }
 0x195   :  { %v893_v5 = vsel %vm729_vm1, %v876_v33, 0.0  ;;  %1248 = vtanh.f32 %v832_v37  ;;  %v971_v37 = vadd.f32 %v1193_v8, %v970_v52 }
 0x196   :  { %v895_v12 = vsel %vm731_vm3, %v878_v58, 0.0 }
 0x199   :  { %v803_v25 = vpop.permute.xlu0 %802 }
 0x19a   :  { %v1729_v0 = vpop.permute.xlu1 %807  ;;  %v1247_v2 = vpop.eup %1246  ;;  %v839_v48 = vsub.f32 %v803_v25, %v1724_v49 }
 0x19b   :  { %v861_v3 = vmul.f32 0.5, %v1247_v2  ;;  %v1249_v11 = vpop.eup %1248  ;;  %v840_v4 = vsub.f32 %v1729_v0, %v1724_v49 }
 0x19c   :  { %v864_v21 = vmul.f32 0.5, %v1249_v11 }
 0x19d   :  { %v877_v27 = vadd.f32 0.5, %v861_v3 }
 0x19e   :  { %v880_v14 = vadd.f32 0.5, %v864_v21 }
 0x19f   :  { %v894_v6 = vsel %vm730_vm2, %v877_v27, 0.0  ;;  %vm991_vm2 = vcmask 1040384  }
 0x1a0   :  { %v909_v53 = vadd.f32 %v894_v6, %v893_v5  ;;  %v897_v43 = vsel %vm733_vm5, %v880_v14, 0.0 }
 0x1a2   :  { %v763_v7 = vpop.permute.xlu1 %762  ;;  %v910_v51 = vadd.f32 %v909_v53, %v895_v12  ;;  %v778_v16 = vpop.permute.xlu2 %777 }
 0x1a3   :  { %v831_v63 = vsub.f32 %v763_v7, %v1724_v49  ;;  %v834_v26 = vsub.f32 %v778_v16, %v1724_v49 }
 0x1a5   :  { %1250 = vtanh.f32 %v831_v63 }
 0x1aa   :  { %v783_v24 = vpop.permute.xlu2 %782 }
 0x1ab   :  { %v1251_v13 = vpop.eup %1250  ;;  %v835_v10 = vsub.f32 %v783_v24, %v1724_v49 }
 0x1ac   :  { %v863_v18 = vmul.f32 0.5, %v1251_v13 }
 0x1ae   :  { %v879_v15 = vadd.f32 0.5, %v863_v18 }
 0x1b0   :  { %v896_v36 = vsel %vm732_vm4, %v879_v15, 0.0 }
 0x1b1   :  { %v911_v20 = vadd.f32 %v910_v51, %v896_v36 }
 0x1b2   :  { %v813_v28 = vpop.permute.xlu2 %812 }
 0x1b3   :  { %v912_v22 = vadd.f32 %v911_v20, %v897_v43  ;;  %v841_v62 = vsub.f32 %v813_v28, %v1724_v49 }
 0x1b9   :  { %v773_v23 = vpop.permute.xlu1 %772 }
 0x1ba   :  { %v833_v41 = vsub.f32 %v773_v23, %v1724_v49  ;;  %v694_v45 = vpop.permute.xlu2 %693 }
 0x1bb   :  { %vm738_vm11 = vcmp.lt.f32.partialorder %v694_v45, %v1532_v17 }
 0x1bc   :  { %1252 = vtanh.f32 %v833_v41  ;;  %v1195_v18 = vsel %vm738_vm11, 1.0, %v1329_v19 }
 0x1bd   :  { %1254 = vtanh.f32 %v834_v26 }
 0x1be   :  { %1256 = vtanh.f32 %v835_v10 }
 0x1c1   :  { %v689_v29 = vpop.permute.xlu1 %688 }
 0x1c2   :  { %v1253_v59 = vpop.eup %1252  ;;  %vm737_vm10 = vcmp.lt.f32.partialorder %v689_v29, %v1532_v17  ;;  %v704_v12 = vpop.permute.xlu2 %703 }
 0x1c3   :  { %v865_v1 = vmul.f32 0.5, %v1253_v59  ;;  %v1255_v35 = vpop.eup %1254  ;;  %v1194_v33 = vsel %vm737_vm10, 1.0, %v1329_v19  ;;  %vm740_vm13 = vcmp.lt.f32.partialorder %v704_v12, %v1532_v17 }
 0x1c4   :  { %v1257_v47 = vpop.eup %1256  ;;  %v866_v50 = vmul.f32 0.5, %v1255_v35  ;;  %v972_v53 = vadd.f32 %v1194_v33, %v971_v37  ;;  %v1197_v29 = vsel %vm740_vm13, 1.0, %v1329_v19 }
 0x1c5   :  { %v881_v40 = vadd.f32 0.5, %v865_v1  ;;  %v867_v57 = vmul.f32 0.5, %v1257_v47 }
 0x1c6   :  { %v882_v61 = vadd.f32 0.5, %v866_v50  ;;  %v973_v20 = vadd.f32 %v1195_v18, %v972_v53  ;;  %v892_v18 = vld [vmem:[#allocation3] sm:$0x1] }
 0x1c7   :  { %v898_v46 = vsel %vm734_vm7, %v881_v40, 0.0  ;;  %v883_v0 = vadd.f32 0.5, %v867_v57  ;;  %vm1033_vm7 = vcmask 0  }
 0x1c8   :  { %v913_v3 = vadd.f32 %v912_v22, %v898_v46  ;;  %v899_v27 = vsel %vm735_vm8, %v882_v61, 0.0 }
 0x1c9   :  { %v788_v30 = vpop.permute.xlu0 %787  ;;  %v900_v21 = vsel %vm736_vm9, %v883_v0, 0.0 }
 0x1ca   :  { %v836_v32 = vsub.f32 %v788_v30, %v1724_v49  ;;  %v914_v6 = vadd.f32 %v913_v3, %v899_v27  ;;  %v719_v47 = vpop.permute.xlu2 %718 }
 0x1cb   :  { %vm743_vm0 = vcmp.lt.f32.partialorder %v719_v47, %v1532_v17 }
 0x1cc   :  { %1258 = vtanh.f32 %v836_v32  ;;  %v915_v9 = vadd.f32 %v914_v6, %v900_v21 }
 0x1cd   :  { %1260 = vtanh.f32 %v838_v42 }
 0x1ce   :  { %1262 = vtanh.f32 %v839_v48 }
 0x1d1   :  { %v793_v54 = vpop.permute.xlu1 %792  ;;  %v818_v55 = vpop.permute.xlu0 %817 }
 0x1d2   :  { %v1259_v56 = vpop.eup %1258  ;;  %v837_v60 = vsub.f32 %v793_v54, %v1724_v49  ;;  %v842_v39 = vsub.f32 %v818_v55, %v1724_v49 }
 0x1d3   :  { %v868_v2 = vmul.f32 0.5, %v1259_v56  ;;  %v1261_v58 = vpop.eup %1260 }
 0x1d4   :  { %1264 = vtanh.f32 %v837_v60  ;;  %v1263_v7 = vpop.eup %1262  ;;  %v870_v31 = vmul.f32 0.5, %v1261_v58 }
 0x1d5   :  { %1266 = vtanh.f32 %v840_v4  ;;  %v884_v5 = vadd.f32 0.5, %v868_v2  ;;  %v871_v43 = vmul.f32 0.5, %v1263_v7 }
 0x1d6   :  { %1268 = vtanh.f32 %v841_v62  ;;  %v886_v28 = vadd.f32 0.5, %v870_v31  ;;  %v1200_v62 = vsel %vm743_vm0, 1.0, %v1329_v19 }
 0x1d7   :  { %1270 = vtanh.f32 %v842_v39  ;;  %v901_v14 = vsel %vm737_vm10, %v884_v5, 0.0  ;;  %v887_v1 = vadd.f32 0.5, %v871_v43 }
 0x1d8   :  { %v916_v24 = vadd.f32 %v915_v9, %v901_v14  ;;  %v932_v14 = vld [vmem:[#allocation4] sm:$0x1] }
 0x1d9   :  { %v823_v63 = vpop.permute.xlu1 %822  ;;  %v699_v51 = vpop.permute.xlu0 %698  ;;  %v904_v45 = vsel %vm740_vm13, %v887_v1, 0.0 }
 0x1da   :  { %v1265_v11 = vpop.eup %1264  ;;  %v843_v13 = vsub.f32 %v823_v63, %v1724_v49  ;;  %vm739_vm12 = vcmp.lt.f32.partialorder %v699_v51, %v1532_v17 }
 0x1db   :  { %v869_v15 = vmul.f32 0.5, %v1265_v11  ;;  %v1196_v36 = vsel %vm739_vm12, 1.0, %v1329_v19  ;;  %v1267_v16 = vpop.eup %1266  ;;  %v903_v34 = vsel %vm739_vm12, %v886_v28, 0.0 }
 0x1dc   :  { %1272 = vtanh.f32 %v843_v13  ;;  %v1269_v49 = vpop.eup %1268  ;;  %v974_v41 = vadd.f32 %v1196_v36, %v973_v20  ;;  %v872_v25 = vmul.f32 0.5, %v1267_v16 }
 0x1dd   :  { %v885_v22 = vadd.f32 0.5, %v869_v15  ;;  %v1271_v23 = vpop.eup %1270  ;;  %v873_v10 = vmul.f32 0.5, %v1269_v49 }
 0x1de   :  { %v874_v30 = vmul.f32 0.5, %v1271_v23  ;;  %v975_v42 = vadd.f32 %v1197_v29, %v974_v41  ;;  %v888_v44 = vadd.f32 0.5, %v872_v25 }
 0x1df   :  { %v902_v26 = vsel %vm738_vm11, %v885_v22, 0.0  ;;  %v889_v50 = vadd.f32 0.5, %v873_v10 }
 0x1e0   :  { %v917_v59 = vadd.f32 %v916_v24, %v902_v26  ;;  %v890_v46 = vadd.f32 0.5, %v874_v30 }
 0x1e1   :  { %v709_v32 = vpop.permute.xlu1 %708  ;;  %v714_v35 = vpop.permute.xlu0 %713 }
 0x1e2   :  { %v1273_v38 = vpop.eup %1272  ;;  %v918_v40 = vadd.f32 %v917_v59, %v903_v34  ;;  %vm741_vm14 = vcmp.lt.f32.partialorder %v709_v32, %v1532_v17  ;;  %vm742_vm15 = vcmp.lt.f32.partialorder %v714_v35, %v1532_v17  ;;  %v907_v2 = vsel %vm743_vm0, %v890_v46, 0.0 }
 0x1e3   :  { %v1198_v48 = vsel %vm741_vm14, 1.0, %v1329_v19  ;;  %v875_v54 = vmul.f32 0.5, %v1273_v38  ;;  %v905_v55 = vsel %vm741_vm14, %v888_v44, 0.0  ;;  %v1199_v56 = vsel %vm742_vm15, 1.0, %v1329_v19 }
 0x1e4   :  { %v919_v52 = vadd.f32 %v918_v40, %v904_v45  ;;  %v976_v8 = vadd.f32 %v1198_v48, %v975_v42  ;;  %v906_v60 = vsel %vm742_vm15, %v889_v50, 0.0 }
 0x1e5   :  { %v891_v3 = vadd.f32 0.5, %v875_v54 }
 0x1e6   :  { %v920_v4 = vadd.f32 %v919_v52, %v905_v55  ;;  %v977_v57 = vadd.f32 %v1199_v56, %v976_v8 }
 0x1e8   :  { %v921_v61 = vadd.f32 %v920_v4, %v906_v60  ;;  %v978_v37 = vadd.f32 %v1200_v62, %v977_v57 }
 0x1e9   :  { %v724_v39 = vpop.permute.xlu1 %723 }
 0x1ea   :  { %vm744_vm1 = vcmp.lt.f32.partialorder %v724_v39, %v1532_v17  ;;  %v922_v33 = vadd.f32 %v921_v61, %v907_v2 }
 0x1eb   :  { %v908_v0 = vsel %vm744_vm1, %v891_v3, 0.0  ;;  %v1201_v58 = vsel %vm744_vm1, 1.0, %v1329_v19 }
 0x1ec   :  { %v923_v27 = vadd.f32 %v922_v33, %v908_v0  ;;  %v979_v5 = vadd.f32 %v1201_v58, %v978_v37 }
 0x1ee   :  { %v924_v6 = vrot.slane %v923_v27, 4  ;;  %v980_v53 = vrot.slane %v979_v5, 4 }
 0x1f0   :  { %v925_v12 = vadd.f32 %v924_v6, %v923_v27  ;;  %v981_v7 = vadd.f32 %v980_v53, %v979_v5 }
 0x1f2   :  { %v926_v63 = vrot.slane %v925_v12, 2  ;;  %v982_v51 = vrot.slane %v981_v7, 2 }
 0x1f4   :  { %v927_v11 = vadd.f32 %v926_v63, %v925_v12  ;;  %v983_v21 = vadd.f32 %v982_v51, %v981_v7 }
 0x1f6   :  { %v928_v13 = vrot.slane %v927_v11, 1  ;;  %v984_v31 = vrot.slane %v983_v21, 1 }
 0x1f8   :  { %v929_v17 = vadd.f32 %v928_v13, %v927_v11  ;;  %v985_v15 = vadd.f32 %v984_v31, %v983_v21 }
 0x1fa   :  { %v930_v36 = vadd.f32 %v929_v17, %v892_v18  ;;  %v986_v16 = vadd.f32 %v985_v15, %v932_v14 }
 0x1fc   :  { %931 = vst [vmem:[#allocation3] sm:$0x1] %v930_v36 }
 0x1fd   :  { %987 = vst [vmem:[#allocation4] sm:$0x1] %v986_v16 }
 0x203   :  { %v990_v19 = vld [vmem:[#allocation3] sm:$0x1] }
 0x204   :  { %v1003_v9 = vld [vmem:[#allocation4] sm:$0x1]  ;;  %v992_v20 = vsel %vm991_vm2, %v990_v19, 0.0 }
 0x205   :  { %v1004_v49 = vsel %vm991_vm2, %v1003_v9, 0.0  ;;  %993 = vadd.xlane.f32.xlu0 %v992_v20 }
 0x206   :  { %1005 = vadd.xlane.f32.xlu2 %v1004_v49 }
 0x278   :  { %v994_v43 = vpop.xlane.xlu0 %993 }
 0x279   :  { %v1006_v22 = vpop.xlane.xlu2 %1005  ;;  %v995_v23 = vrot.slane %v994_v43, 4 }
 0x27a   :  { %v1007_v24 = vrot.slane %v1006_v22, 4 }
 0x27b   :  { %v996_v41 = vadd.f32 %v995_v23, %v994_v43 }
 0x27c   :  { %v1008_v25 = vadd.f32 %v1007_v24, %v1006_v22 }
 0x27d   :  { %v997_v26 = vrot.slane %v996_v41, 2 }
 0x27e   :  { %v1009_v28 = vrot.slane %v1008_v25, 2 }
 0x27f   :  { %v998_v10 = vadd.f32 %v997_v26, %v996_v41 }
 0x280   :  { %v1010_v59 = vadd.f32 %v1009_v28, %v1008_v25 }
 0x281   :  { %v999_v1 = vrot.slane %v998_v10, 1 }
 0x282   :  { %v1011_v29 = vrot.slane %v1010_v59, 1 }
 0x283   :  { %v1000_v30 = vadd.f32 %v999_v1, %v998_v10 }
 0x284   :  { %v1012_v34 = vadd.f32 %v1011_v29, %v1010_v59 }
 0x285   :  { %1226 = vpush %v1000_v30 }
 0x286   :  { %1228 = vpush %v1012_v34 }
 0x2b6   :  { %s1227_s7 = spop %1226 }
 0x2b7   :  { %s1229_s16 = spop %1228  ;;  %v1002_v8 = vstv %s1227_s7 }
 0x2b8   :  { %v1014_v32 = vstv %s1229_s16 }
 0x2b9   :  { %v1016_v35 = vmax.f32 %v1014_v32, 1.0  ;;  %vm1015_vm8 = vcmp.gt.f32.partialorder %v1014_v32, 0.0 }
 0x2bb   :  { %1274 = vrcp.f32 %v1016_v35  ;;  %v1028_v44 = vand.u32 2147483648, %v1016_v35  ;;  %v1026_v47 = vand.u32 2147483647, %v1016_v35  ;;  %vm1022_vm4 = vweird.f32 %v1016_v35 }
 0x2bd   :  { %v1029_v50 = vor.u32 1.1754944e-38, %v1028_v44  ;;  %vm1027_vm6 = vcmp.eq.f32.partialorder %v1026_v47, 8.507059e+37 }
 0x2c1   :  { %v1275_v38 = vpop.eup %1274 }
 0x2c2   :  { %v1018_v40 = vmul.f32 %v1275_v38, %v1016_v35  ;;  %vm1023_vm3 = vweird.f32 %v1275_v38 }
 0x2c3   :  { %vm1024_vm5 = vmor %vm1022_vm4, %vm1023_vm3 }
 0x2c4   :  { %v1019_v42 = vsub.f32 1.0, %v1018_v40 }
 0x2c6   :  { %v1020_v45 = vmul.f32 %v1275_v38, %v1019_v42 }
 0x2c8   :  { %v1021_v48 = vadd.f32 %v1275_v38, %v1020_v45 }
 0x2ca   :  { %v1025_v52 = vsel %vm1024_vm5, %v1275_v38, %v1021_v48 }
 0x2cb   :  { %v1030_v46 = vsel %vm1027_vm6, %v1029_v50, %v1025_v52 }
 0x2cc   :  { %v1031_v54 = vmul.f32 %v1030_v46, %v1002_v8 }
 0x2ce   :  { %v1032_v55 = vsel %vm1015_vm8, %v1031_v54, 0.0 }
 0x2cf   :  { %1034 = vst.msk [vmem:[#allocation8] sm:$0x1] %vm1033_vm7, %v1032_v55 }
 0x2d0   :  { %1056 = dma.vmem_to_hbm [thread:$0]  %s1052_s0, 16, %s1054_s20, [#allocation9]  }
 0x2d1   :  { %1324 = dma.done.wait [#allocation7], 16  }
 0x2d2   :  { %1325 = vsyncadd [#allocation7], 4294967280 }
 0x2d3   :  { %1326 = dma.done.wait [#allocation9], 16  }
 0x2d4   :  { %1327 = vsyncadd [#allocation9], 4294967280 }
 0x2d5   :  { %1065 = vsyncpa [#allocation7], 1 }
 0x2d6   :  { %1066 = vsyncpa [#allocation9], 1 }

</bundles_post_ra>
